<compile_context>
chip_gen: v5e
topology: v5e:2x2
jax: 0.10.0
libtpu: 0.0.40
codegen_flags: <defaults>
</compile_context>

<pallas_src>
import functools
import numpy as np

import jax
import jax.numpy as jnp
from jax.experimental import pallas as pl
from jax.experimental.pallas import tpu as pltpu  # noqa: F401  (TPU backend)

EPS = 1e-6  # nn.LayerNorm(d_model, eps=1e-06)


# ----------------------------------------------------------------------------
# in-kernel helpers
# ----------------------------------------------------------------------------
def _layernorm(x, gamma, beta):
    # reduce over last dim; biased variance, matching torch LayerNorm.
    mean = jnp.mean(x, axis=-1, keepdims=True)
    var = jnp.mean((x - mean) ** 2, axis=-1, keepdims=True)
    return (x - mean) * jax.lax.rsqrt(var + EPS) * gamma + beta


# ----------------------------------------------------------------------------
# kernel 1: x + pos_table -> dropout(eval, identity) -> LayerNorm
# (whole batch resident; runs once)
# ----------------------------------------------------------------------------
def posenc_ln_kernel(x_ref, pos_ref, g_ref, b_ref, o_ref):
    x = x_ref[...]          # (B, L, D) f32
    pos = pos_ref[...]      # (1, L, D) f32
    o_ref[...] = _layernorm(x + pos, g_ref[...], b_ref[...])


# ----------------------------------------------------------------------------
# kernel 2: one full encoder layer, fused:
#   MHA (fused qkv proj -> per-head masked softmax attn -> fused out proj)
#   -> +residual -> LN  ->  FFN (w2(relu(w1(x)))) -> +residual -> LN
# ----------------------------------------------------------------------------
def encoder_layer_kernel(x_ref, mask_ref, wqkv_ref, wo_ref,
                         ln1g_ref, ln1b_ref,
                         w1_ref, b1_ref, w2_ref, b2_ref,
                         ln2g_ref, ln2b_ref, o_ref,
                         *, n_head, d_k, d_v):
    f32 = jnp.float32
    bf16 = jnp.bfloat16

    x = x_ref[...]                              # (B, L, D) f32
    B, L, D = x.shape
    Hdk = n_head * d_k
    Hdv = n_head * d_v
    inv_temp = 1.0 / float(np.sqrt(d_k))

    # additive key mask bias, computed once (hoisted out of head loop)
    bias = jnp.where(mask_ref[...] == 0.0, -1e9, 0.0)        # (B, 1, L) f32

    x2 = x.reshape(B * L, D)                    # sublane-dense 2D view
    xb = x2.astype(bf16)

    # --- fused Q/K/V projection: one lane-dense bf16 matmul, f32 accumulate
    qkv = jnp.dot(xb, wqkv_ref[...], preferred_element_type=f32)  # (B*L, 2Hdk+Hdv)
    q = (qkv[:, :Hdk] * inv_temp).reshape(B, L, Hdk).astype(bf16)
    k = qkv[:, Hdk:2 * Hdk].reshape(B, L, Hdk).astype(bf16)
    v = qkv[:, 2 * Hdk:].reshape(B, L, Hdv).astype(bf16)

    # --- per-head scaled dot-product attention; softmax kept in f32
    heads = []
    for h in range(n_head):                     # static unroll; only S/PV per head
        qh = q[:, :, h * d_k:(h + 1) * d_k]
        kh = k[:, :, h * d_k:(h + 1) * d_k]
        vh = v[:, :, h * d_v:(h + 1) * d_v]
        s = jnp.einsum("blk,bmk->blm", qh, kh,
                       preferred_element_type=f32)            # (B, L, L)
        s = s + bias
        s = s - jnp.max(s, axis=-1, keepdims=True)
        p = jnp.exp(s)
        p = p * pl.reciprocal(jnp.sum(p, axis=-1, keepdims=True), approx=True)
        heads.append(jnp.einsum("blm,bmv->blv", p.astype(bf16), vh,
                                preferred_element_type=f32))  # (B, L, dv)

    concat = jnp.concatenate(heads, axis=-1).reshape(B * L, Hdv)   # f32
    attn = jnp.dot(concat.astype(bf16), wo_ref[...],
                   preferred_element_type=f32)                # (B*L, D)

    # residual + LayerNorm (attention sublayer)
    y = _layernorm(attn + x2, ln1g_ref[...], ln1b_ref[...])   # (B*L, D) f32

    # --- position-wise feed-forward sublayer
    h1 = jnp.dot(y.astype(bf16), w1_ref[...],
                 preferred_element_type=f32) + b1_ref[...]
    h1 = jnp.maximum(h1, 0.0)
    z = jnp.dot(h1.astype(bf16), w2_ref[...],
                preferred_element_type=f32) + b2_ref[...]
    z = _layernorm(z + y, ln2g_ref[...], ln2b_ref[...])
    o_ref[...] = z.reshape(B, L, D)


# ----------------------------------------------------------------------------
# wrapper: whole problem in VMEM per call (no per-sequence grid overhead)
# ----------------------------------------------------------------------------
def encoder_forward(src_seq, src_mask, params):
    """src_seq: (B, L, D) float32 embeddings; src_mask: (B, 1, L) float32 0/1."""
    B, L, D = src_seq.shape
    pos = params["pos_table"][:, :L, :]                       # (1, L, D)

    # positional encoding + dropout(eval) + layer_norm
    enc = pl.pallas_call(
        posenc_ln_kernel,
        out_shape=jax.ShapeDtypeStruct((B, L, D), jnp.float32),
    )(src_seq, pos, params["ln0_g"], params["ln0_b"])

    # encoder layer stack (one fused kernel per layer)
    for lp in params["layers"]:
        H, _, d_k = lp["wq"].shape
        d_v = lp["wv"].shape[2]

        # fuse head projections into lane-dense matrices; weights in bf16
        wq = jnp.transpose(lp["wq"], (1, 0, 2)).reshape(D, H * d_k)
        wk = jnp.transpose(lp["wk"], (1, 0, 2)).reshape(D, H * d_k)
        wv = jnp.transpose(lp["wv"], (1, 0, 2)).reshape(D, H * d_v)
        wqkv = jnp.concatenate([wq, wk, wv], axis=1).astype(jnp.bfloat16)
        wo = lp["wo"].reshape(H * d_v, D).astype(jnp.bfloat16)
        w1 = lp["w1"].astype(jnp.bfloat16)
        w2 = lp["w2"].astype(jnp.bfloat16)

        kernel = functools.partial(encoder_layer_kernel,
                                   n_head=H, d_k=d_k, d_v=d_v)
        enc = pl.pallas_call(
            kernel,
            out_shape=jax.ShapeDtypeStruct((B, L, D), jnp.float32),
        )(enc, src_mask, wqkv, wo,
          lp["ln_attn_g"], lp["ln_attn_b"],
          w1, lp["b1"], w2, lp["b2"],
          lp["ln_ffn_g"], lp["ln_ffn_b"])

    return (enc,)


# ----------------------------------------------------------------------------
# pure-JAX reference (f32) for a correctness check
# ----------------------------------------------------------------------------
def _ln_ref(x, g, b):
    m = jnp.mean(x, axis=-1, keepdims=True)
    v = jnp.mean((x - m) ** 2, axis=-1, keepdims=True)
    return (x - m) / jnp.sqrt(v + EPS) * g + b


def encoder_ref(src_seq, src_mask, params):
    B, L, D = src_seq.shape
    x = src_seq + params["pos_table"][:, :L, :]
    x = _ln_ref(x, params["ln0_g"], params["ln0_b"])
    for lp in params["layers"]:
        n_head, _, d_k = lp["wq"].shape
        res = x
        q = jnp.einsum("bld,hdk->bhlk", x, lp["wq"])
        k = jnp.einsum("bld,hdk->bhlk", x, lp["wk"])
        v = jnp.einsum("bld,hdk->bhlk", x, lp["wv"])
        s = jnp.einsum("bhqk,bhmk->bhqm", q / np.sqrt(d_k), k)
        mask = src_mask[:, None, :, :]  # (B,1,1,L)
        s = jnp.where(mask == 0.0, -1e9, s)
        p = jax.nn.softmax(s, axis=-1)
        o = jnp.einsum("bhqm,bhmv->bhqv", p, v)
        o = jnp.einsum("bhqv,hvd->bqd", o, lp["wo"])
        x = _ln_ref(o + res, lp["ln_attn_g"], lp["ln_attn_b"])
        res = x
        h = jnp.maximum(jnp.einsum("bld,df->blf", x, lp["w1"]) + lp["b1"], 0.0)
        y = jnp.einsum("blf,fd->bld", h, lp["w2"]) + lp["b2"]
        x = _ln_ref(y + res, lp["ln_ffn_g"], lp["ln_ffn_b"])
    return x


# ----------------------------------------------------------------------------
# parameter construction (deterministic)
# ----------------------------------------------------------------------------
def sinusoid_table(n_position, d_hid):
    pos = np.arange(n_position)[:, None].astype(np.float64)
    j = np.arange(d_hid)[None, :]
    angle = pos / np.power(10000.0, 2 * (j // 2) / d_hid)
    table = np.array(angle)
    table[:, 0::2] = np.sin(table[:, 0::2])
    table[:, 1::2] = np.cos(table[:, 1::2])
    return jnp.asarray(table[None, :, :], dtype=jnp.float32)  # (1, n_pos, d_hid)


def make_params(key, d_model, d_inner, n_layers, n_head, d_k, d_v, n_position):
    def rnd(k, shape):
        return (0.1 * jax.random.normal(k, shape)).astype(jnp.float32)

    layers = []
    for _ in range(n_layers):
        key, *ks = jax.random.split(key, 7)
        layers.append(dict(
            wq=rnd(ks[0], (n_head, d_model, d_k)),
            wk=rnd(ks[1], (n_head, d_model, d_k)),
            wv=rnd(ks[2], (n_head, d_model, d_v)),
            wo=rnd(ks[3], (n_head, d_v, d_model)),
            ln_attn_g=jnp.ones((1, d_model), jnp.float32),
            ln_attn_b=jnp.zeros((1, d_model), jnp.float32),
            w1=rnd(ks[4], (d_model, d_inner)),
            b1=jnp.zeros((1, d_inner), jnp.float32),
            w2=rnd(ks[5], (d_inner, d_model)),
            b2=jnp.zeros((1, d_model), jnp.float32),
            ln_ffn_g=jnp.ones((1, d_model), jnp.float32),
            ln_ffn_b=jnp.zeros((1, d_model), jnp.float32),
        ))
    return dict(
        pos_table=sinusoid_table(n_position, d_model),
        ln0_g=jnp.ones((1, d_model), jnp.float32),
        ln0_b=jnp.zeros((1, d_model), jnp.float32),
        layers=layers,
    )


# ----------------------------------------------------------------------------
if __name__ == "__main__":
    B, L = 2, 8
    d_model, d_inner = 32, 64
    n_head, d_k, d_v = 4, 8, 8
    n_layers = 1
    n_position = 64  # default n_position = 8 * 8

    key = jax.random.PRNGKey(0)
    key, k_x = jax.random.split(key)
    src_seq = jax.random.normal(k_x, (B, L, d_model), dtype=jnp.float32)

    # src_mask: (B, 1, L), 1 = valid token, 0 = padding
    lengths = jnp.array([L, L - 3], dtype=jnp.int32)
    src_mask = (jnp.arange(L)[None, :] < lengths[:, None]).astype(jnp.float32)
    src_mask = src_mask[:, None, :]

    params = make_params(key, d_model, d_inner, n_layers, n_head, d_k, d_v,
                         n_position)

    (out,) = encoder_forward(src_seq, src_mask, params)
    out = jax.block_until_ready(out)

    ref = jax.block_until_ready(encoder_ref(src_seq, src_mask, params))
    assert out.shape == (B, L, d_model)
    # kernel matmuls use bf16 inputs with f32 accumulation -> slightly looser tol
    np.testing.assert_allclose(np.asarray(out), np.asarray(ref),
                               atol=2e-2, rtol=2e-2)
    print("KERNEL_OK")
</pallas_src>

<mosaic_0001>
module attributes {stable_mosaic.version = 11 : i64} {
  func.func @posenc_ln_kernel(%arg0: memref<2x8x32xf32, #tpu.memory_space<vmem>>, %arg1: memref<1x8x32xf32, #tpu.memory_space<vmem>>, %arg2: memref<1x32xf32, #tpu.memory_space<vmem>>, %arg3: memref<1x32xf32, #tpu.memory_space<vmem>>, %arg4: memref<2x8x32xf32, #tpu.memory_space<vmem>>) attributes {dimension_semantics = [], scalar_prefetch = 0 : i64, scratch_operands = 0 : i64, tpu.core_type = #tpu.core_type<tc>} {
    %c0 = arith.constant 0 : index
    %c0_0 = arith.constant 0 : index
    %c0_1 = arith.constant 0 : index
    %0 = vector.load %arg0[%c0, %c0_0, %c0_1] : memref<2x8x32xf32, #tpu.memory_space<vmem>>, vector<2x8x32xf32>
    %c0_2 = arith.constant 0 : index
    %c0_3 = arith.constant 0 : index
    %c0_4 = arith.constant 0 : index
    %1 = vector.load %arg1[%c0_2, %c0_3, %c0_4] : memref<1x8x32xf32, #tpu.memory_space<vmem>>, vector<1x8x32xf32>
    %2 = vector.broadcast %1 : vector<1x8x32xf32> to vector<2x8x32xf32>
    %3 = arith.addf %0, %2 : vector<2x8x32xf32>
    %c0_5 = arith.constant 0 : index
    %c0_6 = arith.constant 0 : index
    %4 = vector.load %arg2[%c0_5, %c0_6] : memref<1x32xf32, #tpu.memory_space<vmem>>, vector<1x32xf32>
    %c0_7 = arith.constant 0 : index
    %c0_8 = arith.constant 0 : index
    %5 = vector.load %arg3[%c0_7, %c0_8] : memref<1x32xf32, #tpu.memory_space<vmem>>, vector<1x32xf32>
    %cst = arith.constant dense<0.000000e+00> : vector<2x8xf32>
    %6 = vector.multi_reduction <add>, %3, %cst [2] : vector<2x8x32xf32> to vector<2x8xf32>
    %7 = vector.shape_cast %6 : vector<2x8xf32> to vector<2x8x1xf32>
    %cst_9 = arith.constant 3.200000e+01 : f32
    %8 = vector.broadcast %cst_9 : f32 to vector<2x8x1xf32>
    %9 = arith.divf %7, %8 : vector<2x8x1xf32>
    %10 = vector.broadcast %9 : vector<2x8x1xf32> to vector<2x8x32xf32>
    %11 = arith.subf %3, %10 : vector<2x8x32xf32>
    %12 = arith.mulf %11, %11 : vector<2x8x32xf32>
    %cst_10 = arith.constant dense<0.000000e+00> : vector<2x8xf32>
    %13 = vector.multi_reduction <add>, %12, %cst_10 [2] : vector<2x8x32xf32> to vector<2x8xf32>
    %14 = vector.shape_cast %13 : vector<2x8xf32> to vector<2x8x1xf32>
    %cst_11 = arith.constant 3.200000e+01 : f32
    %15 = vector.broadcast %cst_11 : f32 to vector<2x8x1xf32>
    %16 = arith.divf %14, %15 : vector<2x8x1xf32>
    %17 = vector.broadcast %9 : vector<2x8x1xf32> to vector<2x8x32xf32>
    %18 = arith.subf %3, %17 : vector<2x8x32xf32>
    %cst_12 = arith.constant 9.99999997E-7 : f32
    %19 = vector.broadcast %cst_12 : f32 to vector<2x8x1xf32>
    %20 = arith.addf %16, %19 : vector<2x8x1xf32>
    %21 = math.rsqrt %20 : vector<2x8x1xf32>
    %22 = vector.broadcast %21 : vector<2x8x1xf32> to vector<2x8x32xf32>
    %23 = arith.mulf %18, %22 : vector<2x8x32xf32>
    %24 = vector.shape_cast %4 : vector<1x32xf32> to vector<1x1x32xf32>
    %25 = vector.broadcast %24 : vector<1x1x32xf32> to vector<2x8x32xf32>
    %26 = arith.mulf %23, %25 : vector<2x8x32xf32>
    %27 = vector.shape_cast %5 : vector<1x32xf32> to vector<1x1x32xf32>
    %28 = vector.broadcast %27 : vector<1x1x32xf32> to vector<2x8x32xf32>
    %29 = arith.addf %26, %28 : vector<2x8x32xf32>
    %c0_13 = arith.constant 0 : index
    %c0_14 = arith.constant 0 : index
    %c0_15 = arith.constant 0 : index
    %30 = vector.load %arg4[%c0_13, %c0_14, %c0_15] : memref<2x8x32xf32, #tpu.memory_space<vmem>>, vector<2x8x32xf32>
    tpu.vector_store %arg4[%c0_13, %c0_14, %c0_15], %29 {strides = array<i32>} : memref<2x8x32xf32, #tpu.memory_space<vmem>>, vector<2x8x32xf32>,
    return
  }
}

</mosaic_0001>

<bundles_post_ra>
// kernel: tpu_custom_call.1
= control target key start
LH: loop header
LB: loop body
LE: loop exit
PB: predicated region body
PF: predicated region fallthrough
CT: control target
= control target key end

     0   :  { %9 = vsyncpa [#allocation3], 0  ;;  %s289_s0 = inlined_call_operand.hbm [shape: f32[2,8,32], index: 0, kind: input, shape index: {}]   ;;  %s290_s1 = inlined_call_operand.hbm [shape: f32[1,8,32], index: 1, kind: input, shape index: {}]   ;;  %s291_s2 = inlined_call_operand.vmem [shape: f32[1,32], index: 2, kind: input, shape index: {}]   ;;  %s292_s3 = inlined_call_operand.vmem [shape: f32[1,32], index: 3, kind: input, shape index: {}]   ;;  %s293_s4 = inlined_call_operand.hbm [shape: f32[2,8,32], index: 4, kind: output, shape index: {}]  }
   0x1   :  { %10 = vsyncpa [#allocation6], 0 }
   0x2   :  { %11 = vsyncpa [#allocation4], 0  ;;  %s16_s17 = sshll.u32 %s289_s0, 4  ;;  %s231_s18 = smov [#allocation2]   ;;  %s17_s17 = int_to_ptr.hbm [resolvable:$true] %s16_s17 }
   0x3   :  { %s18_s19 = sshll.u32 %s231_s18, 4  ;;  %s30_s22 = sshll.u32 %s290_s1, 4  ;;  %s19_s19 = int_to_ptr.vmem [resolvable:$true] %s18_s19  ;;  %s31_s22 = int_to_ptr.hbm [resolvable:$true] %s30_s22 }
   0x4   :  { %s232_s23 = smov 128   ;;  %s233_s24 = smov 8  }
   0x5   :  { %24 = dma.hbm_to_vmem [thread:$0]  %s17_s17, 256, %s19_s19, [#allocation3], %s232_s23, %s232_s23, %s233_s24  }
   0x6   :  { %s234_s25 = smov [#allocation5]  }
   0x7   :  { %s32_s26 = sshll.u32 %s234_s25, 4  ;;  %s33_s26 = int_to_ptr.vmem [resolvable:$true] %s32_s26 }
   0x8   :  { %35 = dma.hbm_to_vmem [thread:$0]  %s31_s22, 128, %s33_s26, [#allocation6]  }
   0x9   :  { %225 = dma.done.wait [#allocation3], 256  }
   0xa   :  { %226 = vsyncadd [#allocation3], 4294967040 }
   0xb   :  { %227 = dma.done.wait [#allocation6], 128  }
   0xc   :  { %228 = vsyncadd [#allocation6], 4294967168  ;;  %v48_v0 = vld [vmem:[#allocation2] sm:$0xff]  ;;  %v50_v1 = vld [vmem:[#allocation5] sm:$0xff]  ;;  %vm55_vm0 = vcmask 261120   ;;  %v235_v7 = vmov 32.0  }
   0xd   :  { %v51_v2 = vadd.f32 %v50_v1, %v48_v0  ;;  %v49_v3 = vld [vmem:[#allocation2 + $0x8] sm:$0xff]  ;;  %147 = vrcp.f32 %v235_v7  ;;  %v145_v38 = vld [vmem:[%s291_s2] ss:$0 sm:$0xff]  ;;  %s236_s2 = smov [#allocation7]   ;;  %s125_s6 = sshll.u32 %s293_s4, 4  ;;  %s126_s6 = int_to_ptr.hbm [resolvable:$true] %s125_s6 }
   0xe   :  { %v52_v5 = vadd.f32 %v50_v1, %v49_v3  ;;  %v146_v42 = vld [vmem:[%s292_s3] ss:$0 sm:$0xff]  ;;  %s123_s29 = sshll.u32 %s236_s2, 4  ;;  %s124_s29 = int_to_ptr.vmem [resolvable:$true] %s123_s29 }
   0xf   :  { %v56_v4 = vsel %vm55_vm0, %v51_v2, 0.0 }
  0x10   :  { %57 = vadd.xlane.f32.xlu0 %v56_v4  ;;  %v59_v6 = vsel %vm55_vm0, %v52_v5, 0.0 }
  0x13   :  { %v148_v8 = vpop.eup %147 }
  0x14   :  { %v63_v9 = vmul.f32 32.0, %v148_v8  ;;  %vm67_vm1 = vweird.f32 %v148_v8 }
  0x16   :  { %v64_v10 = vsub.f32 1.0, %v63_v9 }
  0x18   :  { %60 = vadd.xlane.f32.xlu0 %v59_v6  ;;  %v65_v11 = vmul.f32 %v148_v8, %v64_v10 }
  0x1a   :  { %v66_v12 = vadd.f32 %v148_v8, %v65_v11 }
  0x1c   :  { %v68_v13 = vsel %vm67_vm1, %v148_v8, %v66_v12 }
  0x83   :  { %v58_v14 = vpop.xlane.xlu0 %57 }
  0x84   :  { %v69_v15 = vmul.f32 %v68_v13, %v58_v14 }
  0x86   :  { %v71_v16 = vsub.f32 %v51_v2, %v69_v15 }
  0x88   :  { %v73_v17 = vmul.f32 %v71_v16, %v71_v16 }
  0x8a   :  { %v75_v18 = vsel %vm55_vm0, %v73_v17, 0.0 }
  0x8b   :  { %76 = vadd.xlane.f32.xlu1 %v75_v18  ;;  %v61_v19 = vpop.xlane.xlu0 %60 }
  0x8c   :  { %v70_v20 = vmul.f32 %v68_v13, %v61_v19 }
  0x8e   :  { %v72_v21 = vsub.f32 %v52_v5, %v70_v20 }
  0x90   :  { %v74_v22 = vmul.f32 %v72_v21, %v72_v21 }
  0x92   :  { %v78_v23 = vsel %vm55_vm0, %v74_v22, 0.0 }
  0x93   :  { %79 = vadd.xlane.f32.xlu1 %v78_v23 }
  0xfe   :  { %v77_v24 = vpop.xlane.xlu1 %76 }
  0xff   :  { %v81_v25 = vmul.f32 %v77_v24, %v68_v13 }
 0x101   :  { %v83_v26 = vadd.f32 1e-06, %v81_v25 }
 0x103   :  { %149 = vrsqrt.f32 %v83_v26  ;;  %vm91_vm3 = vweird.f32 %v83_v26 }
 0x106   :  { %v80_v27 = vpop.xlane.xlu1 %79 }
 0x107   :  { %v82_v28 = vmul.f32 %v80_v27, %v68_v13 }
 0x109   :  { %v150_v29 = vpop.eup %149  ;;  %v84_v30 = vadd.f32 1e-06, %v82_v28 }
 0x10a   :  { %v86_v31 = vmul.f32 %v150_v29, %v83_v26  ;;  %vm92_vm2 = vweird.f32 %v150_v29 }
 0x10b   :  { %151 = vrsqrt.f32 %v84_v30  ;;  %vm93_vm4 = vmor %vm91_vm3, %vm92_vm2  ;;  %vm101_vm6 = vweird.f32 %v84_v30 }
 0x10c   :  { %v87_v32 = vmul.f32 %v150_v29, %v86_v31 }
 0x10e   :  { %v88_v33 = vmul.f32 0.5, %v87_v32 }
 0x110   :  { %v89_v34 = vsub.f32 1.5, %v88_v33 }
 0x111   :  { %v152_v35 = vpop.eup %151 }
 0x112   :  { %v90_v36 = vmul.f32 %v150_v29, %v89_v34  ;;  %v96_v37 = vmul.f32 %v152_v35, %v84_v30  ;;  %vm102_vm5 = vweird.f32 %v152_v35 }
 0x113   :  { %vm103_vm7 = vmor %vm101_vm6, %vm102_vm5 }
 0x114   :  { %v94_v39 = vsel %vm93_vm4, %v150_v29, %v90_v36  ;;  %v97_v40 = vmul.f32 %v152_v35, %v96_v37 }
 0x115   :  { %v105_v41 = vmul.f32 %v94_v39, %v71_v16 }
 0x116   :  { %v98_v43 = vmul.f32 0.5, %v97_v40 }
 0x117   :  { %v110_v44 = vmul.f32 %v145_v38, %v105_v41 }
 0x118   :  { %v99_v45 = vsub.f32 1.5, %v98_v43 }
 0x119   :  { %v115_v46 = vadd.f32 %v146_v42, %v110_v44 }
 0x11a   :  { %v100_v47 = vmul.f32 %v152_v35, %v99_v45 }
 0x11b   :  { %117 = vst.msk [vmem:[#allocation7] sm:$0xff] %vm55_vm0, %v115_v46 }
 0x11c   :  { %v104_v48 = vsel %vm103_vm7, %v152_v35, %v100_v47 }
 0x11d   :  { %v106_v49 = vmul.f32 %v104_v48, %v72_v21 }
 0x11f   :  { %v111_v50 = vmul.f32 %v145_v38, %v106_v49 }
 0x121   :  { %v116_v51 = vadd.f32 %v146_v42, %v111_v50 }
 0x123   :  { %118 = vst.msk [vmem:[#allocation7 + $0x8] sm:$0xff] %vm55_vm0, %v116_v51 }
 0x124   :  { %131 = dma.vmem_to_hbm [thread:$0]  %s124_s29, 256, %s126_s6, [#allocation4], %s232_s23, %s232_s23, %s233_s24  }
 0x125   :  { %229 = dma.done.wait [#allocation4], 256  }
 0x126   :  { %230 = vsyncadd [#allocation4], 4294967040 }
 0x127   :  { %136 = vsyncpa [#allocation3], 1 }
 0x128   :  { %137 = vsyncpa [#allocation6], 1 }
 0x129   :  { %138 = vsyncpa [#allocation4], 1 }

</bundles_post_ra>
